<compile_context>
chip_gen: v7x
topology: tpu7x:2x2x1
jax: 0.10.0
libtpu: 0.0.40
codegen_flags: <defaults>
</compile_context>

<pallas_src>
import functools

import jax
import jax.numpy as jnp
from jax.experimental import pallas as pl
from jax.experimental.pallas import tpu as pltpu


def _epilogue(acc_f32, i_ref, beta, alpha, out_dtype):
    out = acc_f32
    if alpha != 1.0:
        out = out * jnp.float32(alpha)
    # torch addmm_ with beta == 0 treats beta*i as exactly 0 (i is never read),
    # so NaN/Inf in i must not propagate -> skip the load entirely.  When
    # beta == 0, i_ref is an untouched HBM (ANY-space) ref.
    if beta != 0.0:
        bi = i_ref[...].astype(jnp.float32)
        if beta != 1.0:
            bi = bi * jnp.float32(beta)
        out = out + bi
    return out.astype(out_dtype)


def _addmm_kernel_f32out(i_ref, x_ref, y_ref, o_ref, *, beta, alpha, precision):
    # f32 output: accumulate directly in the resident output block (no scratch).
    k = pl.program_id(2)

    @pl.when(k == 0)
    def _():
        o_ref[...] = jnp.zeros_like(o_ref)

    o_ref[...] += jnp.dot(x_ref[...], y_ref[...],
                          preferred_element_type=jnp.float32,
                          precision=precision)

    @pl.when(k == pl.num_programs(2) - 1)
    def _():
        o_ref[...] = _epilogue(o_ref[...], i_ref, beta, alpha, o_ref.dtype)


def _addmm_kernel_acc(i_ref, x_ref, y_ref, o_ref, acc_ref, *, beta, alpha, precision):
    # Narrow-precision output: keep an f32 VMEM accumulator across the k loop.
    k = pl.program_id(2)

    @pl.when(k == 0)
    def _():
        acc_ref[...] = jnp.zeros_like(acc_ref)

    acc_ref[...] += jnp.dot(x_ref[...], y_ref[...],
                            preferred_element_type=jnp.float32,
                            precision=precision)

    @pl.when(k == pl.num_programs(2) - 1)
    def _():
        o_ref[...] = _epilogue(acc_ref[...], i_ref, beta, alpha, o_ref.dtype)


def addmm_inplace(i, x, y, *, beta=1.0, alpha=2.0,
                  tm=512, tn=1024, tk=512, precision=None):
    """Emulates torch.Tensor.addmm_: i <- beta * i + alpha * (x @ y)."""
    M, K = x.shape
    K2, N = y.shape
    assert K == K2 and i.shape == (M, N), "shape mismatch"

    beta = float(beta)
    alpha = float(alpha)
    stream_i = beta != 0.0                    # DMA `i` tiles only if it is read
    out_dtype = i.dtype
    f32_out = out_dtype == jnp.float32

    def itemsize(a):
        return jnp.dtype(a.dtype).itemsize

    x_b, y_b, i_b = itemsize(x), itemsize(y), itemsize(i)
    o_b = jnp.dtype(out_dtype).itemsize

    # ---- tile selection -----------------------------------------------------
    # Clamp MXU-sized defaults to the problem (block == full dim is legal).
    tm = min(tm, M)
    tn = min(tn, N)
    tk = min(tk, K)

    def footprint(tm_, tn_, tk_):
        # Double-buffered tiles actually resident in VMEM.
        f = 2 * (tm_ * tk_ * x_b + tk_ * tn_ * y_b + tm_ * tn_ * o_b
                 + (tm_ * tn_ * i_b if stream_i else 0))
        if not f32_out:
            f += tm_ * tn_ * 4                # f32 scratch accumulator
        return f

    # Keep the double-buffered working set <= ~24 MiB (v7x has 64 MiB VMEM).
    while footprint(tm, tn, tk) > (24 << 20):
        if tn % 256 == 0:
            tn //= 2
        elif tk % 256 == 0:
            tk //= 2
        elif tm % 16 == 0:
            tm //= 2
        else:
            break

    # Megacore: (m, n) axes are "parallel" and v7x has 2 TensorCores; make
    # sure there are at least 2 parallel tiles where the shape allows it.
    while (M // tm) * (N // tn) < 2:
        if tn % 256 == 0:                     # keep tn a multiple of 128
            tn //= 2
        elif tm % 16 == 0:                    # keep tm a multiple of 8
            tm //= 2
        else:
            break

    assert M % tm == 0 and N % tn == 0 and K % tk == 0, (
        "shapes must tile evenly; pass tm/tn/tk dividing (M, N, K)")
    # TODO(synk): ragged shapes (e.g. M=300) need a cdiv grid + masked edges.

    grid_m, grid_n, grid_k = M // tm, N // tn, K // tk

    if f32_out:
        kernel = functools.partial(_addmm_kernel_f32out, beta=beta, alpha=alpha,
                                   precision=precision)
        scratch_shapes = []
    else:
        kernel = functools.partial(_addmm_kernel_acc, beta=beta, alpha=alpha,
                                   precision=precision)
        scratch_shapes = [pltpu.VMEM((tm, tn), jnp.float32)]

    # `i` is only streamed when it is read; with beta == 0 it stays untouched
    # in HBM (ANY space) but remains argument 0 so its buffer is still aliased
    # to the output (in-place reuse, as addmm_ does).
    if stream_i:
        i_spec = pl.BlockSpec((tm, tn), lambda m, n, k: (m, n))
    else:
        i_spec = pl.BlockSpec(memory_space=pl.ANY)

    bytes_accessed = (
        M * K * x_b * grid_n                  # x re-read once per n tile
        + K * N * y_b * grid_m                # y re-read once per m tile
        + M * N * o_b                         # output write
        + (M * N * i_b if stream_i else 0)    # i read (skipped when beta == 0)
    )
    cost = pl.CostEstimate(flops=2 * M * N * K, transcendentals=0,
                           bytes_accessed=bytes_accessed)

    vmem_limit = int(min(max(footprint(tm, tn, tk) + (16 << 20), 32 << 20),
                         56 << 20))

    return pl.pallas_call(
        kernel,
        out_shape=jax.ShapeDtypeStruct((M, N), out_dtype),
        grid_spec=pltpu.PrefetchScalarGridSpec(
            num_scalar_prefetch=0,
            grid=(grid_m, grid_n, grid_k),
            in_specs=[
                i_spec,                                            # i
                pl.BlockSpec((tm, tk), lambda m, n, k: (m, k)),    # x
                pl.BlockSpec((tk, tn), lambda m, n, k: (k, n)),    # y
            ],
            out_specs=pl.BlockSpec((tm, tn), lambda m, n, k: (m, n)),
            scratch_shapes=scratch_shapes,
        ),
        compiler_params=pltpu.CompilerParams(
            dimension_semantics=("parallel", "parallel", "arbitrary"),
            vmem_limit_bytes=vmem_limit,
        ),
        cost_estimate=cost,
        input_output_aliases={0: 0},          # emulate addmm_ in-place on `i`
    )(i, x, y)


if __name__ == "__main__":
    key = jax.random.PRNGKey(0)
    beta, alpha = 1.0, 2.0

    # ---- Test 1: small shape consistent with the op test --------------------
    M, K, N = 8, 32, 128
    ki, kx, ky = jax.random.split(key, 3)
    i = jax.random.normal(ki, (M, N), dtype=jnp.float32)
    x = jax.random.normal(kx, (M, K), dtype=jnp.float32)
    y = jax.random.normal(ky, (K, N), dtype=jnp.float32)

    out = jax.block_until_ready(addmm_inplace(i, x, y, beta=beta, alpha=alpha))
    ref = beta * i + alpha * (x @ y)
    assert jnp.allclose(out, ref, atol=1e-5, rtol=1e-5), "small-shape mismatch"

    # ---- Test 2: multi-tile grid (k accumulation + megacore tile split) -----
    M2, K2, N2 = 256, 512, 512
    k2 = jax.random.split(key, 6)
    i2 = jax.random.normal(k2[3], (M2, N2), dtype=jnp.float32)
    x2 = jax.random.normal(k2[4], (M2, K2), dtype=jnp.float32)
    y2 = jax.random.normal(k2[5], (K2, N2), dtype=jnp.float32)

    out2 = jax.block_until_ready(addmm_inplace(i2, x2, y2, beta=beta, alpha=alpha))
    ref2 = beta * i2 + alpha * (x2 @ y2)
    rel_err = jnp.max(jnp.abs(out2 - ref2)) / (jnp.max(jnp.abs(ref2)) + 1e-6)
    assert rel_err < 1e-2, f"multi-tile mismatch: rel err {rel_err}"

    # ---- Test 3: beta == 0 -> `i` is never read nor DMA'd -------------------
    i_nan = jnp.full((M, N), jnp.nan, dtype=jnp.float32)
    out3 = jax.block_until_ready(addmm_inplace(i_nan, x, y, beta=0.0, alpha=alpha))
    ref3 = alpha * (x @ y)
    assert not jnp.any(jnp.isnan(out3)), "beta==0 must not propagate NaNs from i"
    assert jnp.allclose(out3, ref3, atol=1e-5, rtol=1e-5), "beta==0 mismatch"

    print("KERNEL_OK")
</pallas_src>

<mosaic_0001>
module attributes {stable_mosaic.version = 11 : i64} {
  func.func @_addmm_kernel_f32out(%arg0: i32, %arg1: i32, %arg2: i32, %arg3: memref<8x128xf32, #tpu.memory_space<vmem>>, %arg4: memref<8x32xf32, #tpu.memory_space<vmem>>, %arg5: memref<32x128xf32, #tpu.memory_space<vmem>>, %arg6: memref<8x128xf32, #tpu.memory_space<vmem>>) attributes {dimension_semantics = [#tpu.dimension_semantics<parallel>, #tpu.dimension_semantics<parallel>, #tpu.dimension_semantics<arbitrary>], iteration_bounds = array<i64: 1, 1, 1>, scalar_prefetch = 0 : i64, scratch_operands = 0 : i64, tpu.core_type = #tpu.core_type<tc>, window_params = [{transform_indices = @transform_0, window_bounds = array<i64: 8, 128>}, {transform_indices = @transform_1, window_bounds = array<i64: 8, 32>}, {transform_indices = @transform_2, window_bounds = array<i64: 32, 128>}, {transform_indices = @transform_3, window_bounds = array<i64: 8, 128>}]} {
    %c0_i32 = arith.constant 0 : i32
    %0 = arith.cmpi eq, %arg2, %c0_i32 : i32
    %1 = arith.extui %0 : i1 to i32
    %c0_i32_0 = arith.constant 0 : i32
    %2 = arith.cmpi ne, %1, %c0_i32_0 : i32
    scf.if %2 {
      %cst_10 = arith.constant 0.000000e+00 : f32
      %12 = vector.broadcast %cst_10 : f32 to vector<8x128xf32>
      %c0_11 = arith.constant 0 : index
      %c0_12 = arith.constant 0 : index
      %13 = vector.load %arg6[%c0_11, %c0_12] : memref<8x128xf32, #tpu.memory_space<vmem>>, vector<8x128xf32>
      tpu.vector_store %arg6[%c0_11, %c0_12], %12 {strides = array<i32>} : memref<8x128xf32, #tpu.memory_space<vmem>>, vector<8x128xf32>,
    } else {
    }
    %c0 = arith.constant 0 : index
    %c0_1 = arith.constant 0 : index
    %3 = vector.load %arg6[%c0, %c0_1] : memref<8x128xf32, #tpu.memory_space<vmem>>, vector<8x128xf32>
    %c0_2 = arith.constant 0 : index
    %c0_3 = arith.constant 0 : index
    %4 = vector.load %arg4[%c0_2, %c0_3] : memref<8x32xf32, #tpu.memory_space<vmem>>, vector<8x32xf32>
    %c0_4 = arith.constant 0 : index
    %c0_5 = arith.constant 0 : index
    %5 = vector.load %arg5[%c0_4, %c0_5] : memref<32x128xf32, #tpu.memory_space<vmem>>, vector<32x128xf32>
    %cst = arith.constant dense<0.000000e+00> : vector<8x128xf32>
    %6 = tpu.matmul %4, %5, %cst {dimension_numbers = #tpu.dot_dimension_numbers<[1], [0], [0], [1], [0, 0, 1, 1], [], []>} : vector<8x32xf32>, vector<32x128xf32>, vector<8x128xf32> -> vector<8x128xf32>
    %7 = arith.addf %3, %6 : vector<8x128xf32>
    %c0_6 = arith.constant 0 : index
    %c0_7 = arith.constant 0 : index
    %8 = vector.load %arg6[%c0_6, %c0_7] : memref<8x128xf32, #tpu.memory_space<vmem>>, vector<8x128xf32>
    tpu.vector_store %arg6[%c0_6, %c0_7], %7 {strides = array<i32>} : memref<8x128xf32, #tpu.memory_space<vmem>>, vector<8x128xf32>,
    %c0_i32_8 = arith.constant 0 : i32
    %9 = arith.cmpi eq, %arg2, %c0_i32_8 : i32
    %10 = arith.extui %9 : i1 to i32
    %c0_i32_9 = arith.constant 0 : i32
    %11 = arith.cmpi ne, %10, %c0_i32_9 : i32
    scf.if %11 {
      %c0_10 = arith.constant 0 : index
      %c0_11 = arith.constant 0 : index
      %12 = vector.load %arg6[%c0_10, %c0_11] : memref<8x128xf32, #tpu.memory_space<vmem>>, vector<8x128xf32>
      %cst_12 = arith.constant 2.000000e+00 : f32
      %13 = vector.broadcast %cst_12 : f32 to vector<8x128xf32>
      %14 = arith.mulf %12, %13 : vector<8x128xf32>
      %c0_13 = arith.constant 0 : index
      %c0_14 = arith.constant 0 : index
      %15 = vector.load %arg3[%c0_13, %c0_14] : memref<8x128xf32, #tpu.memory_space<vmem>>, vector<8x128xf32>
      %16 = arith.addf %14, %15 : vector<8x128xf32>
      %c0_15 = arith.constant 0 : index
      %c0_16 = arith.constant 0 : index
      %17 = vector.load %arg6[%c0_15, %c0_16] : memref<8x128xf32, #tpu.memory_space<vmem>>, vector<8x128xf32>
      tpu.vector_store %arg6[%c0_15, %c0_16], %16 {strides = array<i32>} : memref<8x128xf32, #tpu.memory_space<vmem>>, vector<8x128xf32>,
    } else {
    }
    return
  }
  func.func @transform_0(%arg0: i32, %arg1: i32, %arg2: i32) -> (i32, i32) {
    %c0_i32 = arith.constant 0 : i32
    return %arg0, %arg1 : i32, i32
  }
  func.func @transform_1(%arg0: i32, %arg1: i32, %arg2: i32) -> (i32, i32) {
    %c0_i32 = arith.constant 0 : i32
    return %arg0, %arg2 : i32, i32
  }
  func.func @transform_2(%arg0: i32, %arg1: i32, %arg2: i32) -> (i32, i32) {
    %c0_i32 = arith.constant 0 : i32
    return %arg2, %arg1 : i32, i32
  }
  func.func @transform_3(%arg0: i32, %arg1: i32, %arg2: i32) -> (i32, i32) {
    %c0_i32 = arith.constant 0 : i32
    return %arg0, %arg1 : i32, i32
  }
}

</mosaic_0001>

<bundles_post_ra>
// kernel: tpu_custom_call.1
= control target key start
LH: loop header
LB: loop body
LE: loop exit
PB: predicated region body
PF: predicated region fallthrough
CT: control target
= control target key end

     0   :  { %8 = vsyncpa [#allocation3], 0  ;;  %s329_s0 = inlined_call_operand.hbm [shape: f32[8,128], index: 0, kind: input, shape index: {}, may-alias: {0,3}]   ;;  %s330_s1 = inlined_call_operand.vmem [shape: f32[8,32], index: 1, kind: input, shape index: {}]   ;;  %s331_s2 = inlined_call_operand.hbm [shape: f32[32,128], index: 2, kind: input, shape index: {}]   ;;  %s332_s3 = inlined_call_operand.hbm [shape: f32[8,128], index: 3, kind: output, shape index: {}, may-alias: {0,3}]  }
   0x1   :  { %9 = vsyncpa [#allocation6], 0 }
   0x2   :  { %10 = vsyncpa [#allocation4], 0  ;;  %s255_s12 = smov [#allocation2]   ;;  %s256_s14 = smov [#allocation5]  }
   0x3   :  { %s17_s13 = sshll.u32 %s255_s12, 4  ;;  %s28_s15 = sshll.u32 %s256_s14, 4  ;;  %s18_s13 = int_to_ptr.vmem [resolvable:$true] %s17_s13  ;;  %s283_s15 = int_to_ptr.vmem [resolvable:$true] %s28_s15 }
   0x4   :  { %s183_s18 = scalar_lea.hbm %s329_s0, 128 }
   0x5   :  { %p184_p0 = scmp.ne.s32.totalorder %s329_s0, %s183_s18  ;;  %p187_p1 = scmp.lt.u32.totalorder %s183_s18, %s329_s0 }
   0x7   :  { %p189_p2 = pnand %p187_p1, %p184_p0 }
   0x9   :  { %192 = shalt.err (!%p189_p2)
}
   0xa   :  { %s193_s23 = scalar_lea.vmem %s18_s13, 128  ;;  %p198_p4 = scmp.lt.s32.totalorder %s18_s13, %s18_s13 }
   0xb   :  { %p194_p3 = scmp.ne.s32.totalorder %s18_s13, %s193_s23  ;;  %p199_p5 = scmp.lt.s32.totalorder %s193_s23, %s193_s23 }
   0xd   :  { %p200_p6 = por %p199_p5, %p198_p4 }
   0xf   :  { %p201_p7 = pnand %p200_p6, %p194_p3 }
  0x11   :  { %204 = shalt.err (!%p201_p7)
}
  0x12   :  { %20 = dma.hbm_to_vmem [thread:$0]  %s329_s0, 128, %s18_s13, [#allocation3]  }
  0x13   :  { %s205_s28 = scalar_lea.hbm %s331_s2, 512 }
  0x14   :  { %p206_p8 = scmp.ne.s32.totalorder %s331_s2, %s205_s28  ;;  %p209_p9 = scmp.lt.u32.totalorder %s205_s28, %s331_s2 }
  0x16   :  { %p211_p10 = pnand %p209_p9, %p206_p8 }
  0x18   :  { %214 = shalt.err (!%p211_p10)
}
  0x19   :  { %s215_s6 = scalar_lea.vmem %s283_s15, 512  ;;  %p220_p12 = scmp.lt.s32.totalorder %s283_s15, %s283_s15 }
  0x1a   :  { %p216_p11 = scmp.ne.s32.totalorder %s283_s15, %s215_s6  ;;  %p221_p13 = scmp.lt.s32.totalorder %s215_s6, %s215_s6 }
  0x1c   :  { %p222_p0 = por %p221_p13, %p220_p12 }
  0x1e   :  { %p223_p1 = pnand %p222_p0, %p216_p11 }
  0x20   :  { %226 = shalt.err (!%p223_p1)
}
  0x21   :  { %s257_s0 = smov 128   ;;  %s258_s7 = smov 8  }
  0x22   :  { %34 = dma.hbm_to_vmem [thread:$0]  %s331_s2, 512, %s283_s15, [#allocation6], %s257_s0, %s257_s0, %s258_s7  }
  0x23   :  { %249 = dma.done.wait [#allocation3], 128  }
  0x24   :  { %250 = vsyncadd [#allocation3], 4294967168 }
  0x25   :  { %251 = dma.done.wait [#allocation6], 512  }
  0x26   :  { %252 = vsyncadd [#allocation6], 4294966784  ;;  %v259_v0 = vmov 0.0|0.0   ;;  %vm260_vm0 = vmmov 0   ;;  %v261_v1 = vmov 0.0   ;;  %v48_v2 = vld [vmem:[#allocation5] sm:$0xff] }
  0x27   :  { %169 = vmatprep.subr.bf16.mxu0 %v259_v0  ;;  %166 = vmatprep.mubr.msk.f32.mxu0 %vm260_vm0, %v261_v1  ;;  %v49_v3 = vld [vmem:[#allocation5 + $0x8] sm:$0xff]  ;;  %v50_v4 = vld [vmem:[#allocation5 + $0x10] sm:$0xff]  ;;  %v51_v6 = vld [vmem:[#allocation5 + $0x18] sm:$0xff]  ;;  %vm52_vm1 = vcmask 261120   ;;  %s262_s11 = smov [#allocation7]  }
  0x28   :  { %v170_v5 = vpack.c.bf16 %v49_v3, %v48_v2  ;;  %v173_v7 = vpack.c.bf16 %v51_v6, %v50_v4  ;;  %v47_v8 = vld [vmem:[%s330_s1] sm:$0xff]  ;;  %v133_v11 = vld [vmem:[#allocation2] sm:$0xff]  ;;  %s142_s12 = sshll.u32 %s262_s11, 4  ;;  %s143_s12 = int_to_ptr.vmem [resolvable:$true] %s142_s12 }
  0x29   :  { %s227_s13 = scalar_lea.vmem %s143_s12, 128  ;;  %p232_p3 = scmp.lt.s32.totalorder %s143_s12, %s143_s12 }
  0x2a   :  { %171 = vmatpush3.bf16.msra.mxu0 %v170_v5  ;;  %p228_p2 = scmp.ne.s32.totalorder %s143_s12, %s227_s13  ;;  %p233_p4 = scmp.lt.s32.totalorder %s227_s13, %s227_s13 }
  0x2b   :  { %172 = vmatprep.subr.bf16.mxu0 %v259_v0 }
  0x2c   :  { %p234_p5 = por %p233_p4, %p232_p3 }
  0x2e   :  { %174 = vmatpush3.bf16.msra.mxu0 %v173_v7  ;;  %p235_p6 = pnand %p234_p5, %p228_p2 }
  0x31   :  { %167 = vmatmul.mubr.msk.f32.vlgmr.msra.gmra.mrb[0].mxu0 %vm52_vm1, %v47_v8 }
 0x104   :  { %v122_v9 = vpop.f32.mrb[0].mxu0 }
 0x105   :  { %v168_v10 = vpop.f32.mrb[1].mxu0  ;;  %v132_v12 = vmul.f32 2.0, %v122_v9 }
 0x107   :  { %v134_v13 = vadd.f32 %v133_v11, %v132_v12 }
 0x109   :  { %135 = vst [vmem:[#allocation7] sm:$0xff] %v134_v13 }
 0x10a   :  { %238 = shalt.err (!%p235_p6)
}
 0x10b   :  { %s239_s15 = scalar_lea.hbm %s332_s3, 128 }
 0x10c   :  { %p240_p7 = scmp.ne.s32.totalorder %s332_s3, %s239_s15  ;;  %p243_p8 = scmp.lt.u32.totalorder %s239_s15, %s332_s3 }
 0x10e   :  { %p245_p9 = pnand %p243_p8, %p240_p7 }
 0x110   :  { %248 = shalt.err (!%p245_p9)
}
 0x111   :  { %145 = dma.vmem_to_hbm [thread:$0]  %s143_s12, 128, %s332_s3, [#allocation4]  }
 0x112   :  { %253 = dma.done.wait [#allocation4], 128  }
 0x113   :  { %254 = vsyncadd [#allocation4], 4294967168 }
 0x114   :  { %149 = vsyncpa [#allocation3], 1 }
 0x115   :  { %150 = vsyncpa [#allocation6], 1 }
 0x116   :  { %151 = vsyncpa [#allocation4], 1 }

</bundles_post_ra>
